<compile_context>
chip_gen: v6e
topology: v6e:2x2x1
jax: 0.10.0
libtpu: 0.0.40
codegen_flags: <defaults>
</compile_context>

<pallas_src>
import jax
import jax.numpy as jnp
from jax import lax
from jax.experimental import pallas as pl
from jax.experimental.pallas import tpu as pltpu


HIDDEN = 256
MAX_BATCH_TILE = 2048   # safe for v5e's 16 MiB default scoped VMEM


def value_fn_kernel(s_ref, w1_ref, b1_ref, w2_ref, b2_ref, w3_ref, b3_ref, o_ref):
    """Fused 3-layer MLP: relu(x@W1+b1) -> relu(@W2+b2) -> w3 . h2 + b3."""
    # In-kernel f32 -> bf16 cast (saves a wrapper-side cast pass over the batch).
    x = s_ref[...].astype(jnp.bfloat16)                              # (tb, state_dim)

    # Layer 1: bf16 MXU matmul, f32 accumulate; bias + ReLU on the VPU.
    h1 = jnp.dot(x, w1_ref[...], preferred_element_type=jnp.float32) + b1_ref[...]
    h1 = jnp.maximum(h1, 0.0).astype(jnp.bfloat16)                   # (tb, 256) bf16

    # Layer 2: bf16 MXU matmul, f32 accumulate; bias + ReLU on the VPU.
    h2 = jnp.dot(h1, w2_ref[...], preferred_element_type=jnp.float32) + b2_ref[...]
    h2 = jnp.maximum(h2, 0.0)                                        # (tb, 256) f32

    # Layer 3 (out_features == 1): single MXU contraction producing the
    # lane-dense (1, tb) row directly — no XLU reduce, no reshape/relayout.
    # h2 kept f32 to preserve the previous kernel's numerics.
    v = lax.dot_general(w3_ref[...], h2,
                        dimension_numbers=(((1,), (1,)), ((), ())),
                        preferred_element_type=jnp.float32)          # (1, tb)

    o_ref[...] = (v + b3_ref[0]).astype(o_ref.dtype)


def _round_up(x, m):
    return -(-x // m) * m


def _pick_batch_tile(B, max_tile=MAX_BATCH_TILE):
    """Large tiles to amortize per-grid-step overhead; >=2 tiles when possible
    so the 'parallel' batch axis lands one tile per TensorCore on v7x."""
    b_pad = _round_up(B, 256)
    if b_pad <= 256:
        return b_pad                       # tiny batch: single tile
    half = _round_up(b_pad // 2, 256)      # aim for two tiles
    return min(max_tile, max(256, half))


def value_function_forward(state, params, *, batch_tile=None):
    """Run the fused MLP kernel over the batch dimension.

    state:  (B, state_dim) float32
    params: dict with w1_bf16 (state_dim,256), b1 (1,256), w2_bf16 (256,256),
            b2 (1,256), w3 (1,256) [row], b3 (1,)
    returns (B, 1) float32
    """
    B, state_dim = state.shape
    tb = batch_tile if batch_tile is not None else _pick_batch_tile(B)
    num_tiles = pl.cdiv(B, tb)
    B_pad = num_tiles * tb

    # Only the zero-pad (if ragged) stays in the wrapper; the bf16 cast happens
    # in-kernel and weights are already stored in bf16.
    x = state
    if B_pad != B:
        x = jnp.pad(x, ((0, B_pad - B), (0, 0)))

    w1 = params["w1_bf16"]
    w2 = params["w2_bf16"]
    b1, b2 = params["b1"], params["b2"]
    w3, b3 = params["w3"], params["b3"]          # (1, 256) f32, (1,) f32

    grid = (num_tiles,)
    in_specs = [
        pl.BlockSpec((tb, state_dim), lambda i: (i, 0)),            # state tile (f32)
        pl.BlockSpec((state_dim, HIDDEN), lambda i: (0, 0)),        # W1 (bf16)
        pl.BlockSpec((1, HIDDEN), lambda i: (0, 0)),                # b1 (f32)
        pl.BlockSpec((HIDDEN, HIDDEN), lambda i: (0, 0)),           # W2 (bf16)
        pl.BlockSpec((1, HIDDEN), lambda i: (0, 0)),                # b2 (f32)
        pl.BlockSpec((1, HIDDEN), lambda i: (0, 0)),                # W3 row (f32)
        pl.BlockSpec(memory_space=pltpu.MemorySpace.SMEM),          # b3 scalar in SMEM
    ]
    out_specs = pl.BlockSpec((1, tb), lambda i: (0, i))             # lane-dense row

    flops = 2 * B_pad * HIDDEN * (state_dim + HIDDEN + 1)
    bytes_accessed = (
        B_pad * state_dim * 4          # state read (f32)
        + B_pad * 4                    # output write (f32)
        + state_dim * HIDDEN * 2       # W1 bf16
        + HIDDEN * HIDDEN * 2          # W2 bf16
        + HIDDEN * 4 * 3               # b1, b2, w3 (f32)
        + 4                            # b3
    )

    out = pl.pallas_call(
        value_fn_kernel,
        out_shape=jax.ShapeDtypeStruct((1, B_pad), jnp.float32),
        grid_spec=pltpu.PrefetchScalarGridSpec(
            num_scalar_prefetch=0,
            grid=grid,
            in_specs=in_specs,
            out_specs=out_specs,
        ),
        compiler_params=pltpu.CompilerParams(
            dimension_semantics=("parallel",),   # batch tiles shard across TCs (v7x)
        ),
        cost_estimate=pl.CostEstimate(
            flops=flops, transcendentals=0, bytes_accessed=bytes_accessed),
    )(x, w1, b1, w2, b2, w3, b3)

    return out.reshape(B_pad, 1)[:B]


def init_params(key, state_dim):
    """Deterministic init mirroring PyTorch Linear default (uniform +-1/sqrt(fan_in)).

    Weights stored as (in_features, out_features) so the kernel computes x @ W + b,
    numerically identical to PyTorch's x @ W_pt.T + b. W3 is stored as a (1, 256) row.
    w1/w2 are pre-cast to bf16 once here (no per-call cast kernels).
    """
    ks = jax.random.split(key, 6)

    def lin(kw, kb, fan_in, fan_out):
        bound = 1.0 / jnp.sqrt(jnp.float32(fan_in))
        w = jax.random.uniform(kw, (fan_in, fan_out), jnp.float32, -bound, bound)
        b = jax.random.uniform(kb, (fan_out,), jnp.float32, -bound, bound)
        return w, b

    w1, b1 = lin(ks[0], ks[1], state_dim, HIDDEN)
    w2, b2 = lin(ks[2], ks[3], HIDDEN, HIDDEN)
    w3, b3 = lin(ks[4], ks[5], HIDDEN, 1)
    return {
        "w1": w1, "w1_bf16": w1.astype(jnp.bfloat16), "b1": b1.reshape(1, HIDDEN),
        "w2": w2, "w2_bf16": w2.astype(jnp.bfloat16), "b2": b2.reshape(1, HIDDEN),
        "w3": w3.reshape(1, HIDDEN),   # row layout for the MXU N=1 head
        "b3": b3.reshape(1,),
    }


def reference_forward(state, params):
    """Pure-JAX reference matching the kernel's numerics (bf16 operands, f32 acc)."""
    xb = state.astype(jnp.bfloat16)
    h1 = jnp.maximum(
        jnp.dot(xb, params["w1_bf16"], preferred_element_type=jnp.float32)
        + params["b1"], 0.0)
    h2 = jnp.maximum(
        jnp.dot(h1.astype(jnp.bfloat16), params["w2_bf16"],
                preferred_element_type=jnp.float32) + params["b2"], 0.0)
    return jnp.sum(h2 * params["w3"], axis=-1, keepdims=True) + params["b3"]


if __name__ == "__main__":
    key = jax.random.PRNGKey(0)
    k_state, k_params = jax.random.split(key)

    state_dim = 16
    params = init_params(k_params, state_dim)

    # Multi-tile, aligned batch (tile picker yields 2 tiles -> both TCs on v7x).
    state = jax.random.normal(k_state, (512, state_dim), jnp.float32)
    out = jax.block_until_ready(value_function_forward(state, params))
    ref = reference_forward(state, params)
    assert out.shape == (512, 1)
    assert jnp.allclose(out, ref, atol=1e-2, rtol=1e-2), "mismatch vs JAX reference"

    # Ragged batch (exercises the wrapper's pad-and-slice path, single tile).
    state_small = jax.random.normal(k_state, (40, state_dim), jnp.float32)
    out_small = jax.block_until_ready(value_function_forward(state_small, params))
    ref_small = reference_forward(state_small, params)
    assert out_small.shape == (40, 1)
    assert jnp.allclose(out_small, ref_small, atol=1e-2, rtol=1e-2), "mismatch (ragged)"

    # Explicit large tile path (same path large-batch callers hit).
    state_big = jax.random.normal(k_state, (4096 + 128, state_dim), jnp.float32)
    out_big = jax.block_until_ready(value_function_forward(state_big, params))
    ref_big = reference_forward(state_big, params)
    assert out_big.shape == (4224, 1)
    assert jnp.allclose(out_big, ref_big, atol=1e-2, rtol=1e-2), "mismatch (large)"

    print("KERNEL_OK")
</pallas_src>

<mosaic_0001>
module attributes {stable_mosaic.version = 11 : i64} {
  func.func @value_fn_kernel(%arg0: i32, %arg1: memref<256x16xf32, #tpu.memory_space<vmem>>, %arg2: memref<16x256xbf16, #tpu.memory_space<vmem>>, %arg3: memref<1x256xf32, #tpu.memory_space<vmem>>, %arg4: memref<256x256xbf16, #tpu.memory_space<vmem>>, %arg5: memref<1x256xf32, #tpu.memory_space<vmem>>, %arg6: memref<1x256xf32, #tpu.memory_space<vmem>>, %arg7: memref<1xf32, #tpu.memory_space<smem>>, %arg8: memref<1x256xf32, #tpu.memory_space<vmem>>) attributes {dimension_semantics = [#tpu.dimension_semantics<parallel>], iteration_bounds = array<i64: 2>, scalar_prefetch = 0 : i64, scratch_operands = 0 : i64, tpu.core_type = #tpu.core_type<tc>, window_params = [{transform_indices = @transform_0, window_bounds = array<i64: 256, 16>}, {pipeline_mode = #tpu.pipeline_mode<synchronous>, transform_indices = @transform_1, window_bounds = array<i64: 16, 256>}, {pipeline_mode = #tpu.pipeline_mode<synchronous>, transform_indices = @transform_2, window_bounds = array<i64: 1, 256>}, {pipeline_mode = #tpu.pipeline_mode<synchronous>, transform_indices = @transform_3, window_bounds = array<i64: 256, 256>}, {pipeline_mode = #tpu.pipeline_mode<synchronous>, transform_indices = @transform_4, window_bounds = array<i64: 1, 256>}, {pipeline_mode = #tpu.pipeline_mode<synchronous>, transform_indices = @transform_5, window_bounds = array<i64: 1, 256>}, {transform_indices = @transform_6, window_bounds = array<i64: 1>}, {transform_indices = @transform_7, window_bounds = array<i64: 1, 256>}]} {
    %c0 = arith.constant 0 : index
    %c0_0 = arith.constant 0 : index
    %0 = vector.load %arg1[%c0, %c0_0] : memref<256x16xf32, #tpu.memory_space<vmem>>, vector<256x16xf32>
    %1 = arith.truncf %0 : vector<256x16xf32> to vector<256x16xbf16>
    %c0_1 = arith.constant 0 : index
    %c0_2 = arith.constant 0 : index
    %2 = vector.load %arg2[%c0_1, %c0_2] : memref<16x256xbf16, #tpu.memory_space<vmem>>, vector<16x256xbf16>
    %cst = arith.constant dense<0.000000e+00> : vector<256x256xf32>
    %3 = tpu.matmul %1, %2, %cst {dimension_numbers = #tpu.dot_dimension_numbers<[1], [0], [0], [1], [0, 0, 1, 1], [], []>} : vector<256x16xbf16>, vector<16x256xbf16>, vector<256x256xf32> -> vector<256x256xf32>
    %c0_3 = arith.constant 0 : index
    %c0_4 = arith.constant 0 : index
    %4 = vector.load %arg3[%c0_3, %c0_4] : memref<1x256xf32, #tpu.memory_space<vmem>>, vector<1x256xf32>
    %5 = vector.broadcast %4 : vector<1x256xf32> to vector<256x256xf32>
    %6 = arith.addf %3, %5 : vector<256x256xf32>
    %cst_5 = arith.constant 0.000000e+00 : f32
    %7 = vector.broadcast %cst_5 : f32 to vector<256x256xf32>
    %8 = arith.maximumf %6, %7 : vector<256x256xf32>
    %9 = arith.truncf %8 : vector<256x256xf32> to vector<256x256xbf16>
    %c0_6 = arith.constant 0 : index
    %c0_7 = arith.constant 0 : index
    %10 = vector.load %arg4[%c0_6, %c0_7] : memref<256x256xbf16, #tpu.memory_space<vmem>>, vector<256x256xbf16>
    %cst_8 = arith.constant dense<0.000000e+00> : vector<256x256xf32>
    %11 = tpu.matmul %9, %10, %cst_8 {dimension_numbers = #tpu.dot_dimension_numbers<[1], [0], [0], [1], [0, 0, 1, 1], [], []>} : vector<256x256xbf16>, vector<256x256xbf16>, vector<256x256xf32> -> vector<256x256xf32>
    %c0_9 = arith.constant 0 : index
    %c0_10 = arith.constant 0 : index
    %12 = vector.load %arg5[%c0_9, %c0_10] : memref<1x256xf32, #tpu.memory_space<vmem>>, vector<1x256xf32>
    %13 = vector.broadcast %12 : vector<1x256xf32> to vector<256x256xf32>
    %14 = arith.addf %11, %13 : vector<256x256xf32>
    %cst_11 = arith.constant 0.000000e+00 : f32
    %15 = vector.broadcast %cst_11 : f32 to vector<256x256xf32>
    %16 = arith.maximumf %14, %15 : vector<256x256xf32>
    %c0_12 = arith.constant 0 : index
    %c0_13 = arith.constant 0 : index
    %17 = vector.load %arg6[%c0_12, %c0_13] : memref<1x256xf32, #tpu.memory_space<vmem>>, vector<1x256xf32>
    %cst_14 = arith.constant dense<0.000000e+00> : vector<1x256xf32>
    %18 = tpu.matmul %17, %16, %cst_14 {dimension_numbers = #tpu.dot_dimension_numbers<[1], [1], [0], [0], [0, 0, 1, 0], [], []>} : vector<1x256xf32>, vector<256x256xf32>, vector<1x256xf32> -> vector<1x256xf32>
    %c0_15 = arith.constant 0 : index
    %19 = memref.load %arg7[%c0_15] : memref<1xf32, #tpu.memory_space<smem>>
    %20 = vector.broadcast %19 : f32 to vector<1x256xf32>
    %21 = arith.addf %18, %20 : vector<1x256xf32>
    %c0_16 = arith.constant 0 : index
    %c0_17 = arith.constant 0 : index
    %22 = vector.load %arg8[%c0_16, %c0_17] : memref<1x256xf32, #tpu.memory_space<vmem>>, vector<1x256xf32>
    tpu.vector_store %arg8[%c0_16, %c0_17], %21 {strides = array<i32>} : memref<1x256xf32, #tpu.memory_space<vmem>>, vector<1x256xf32>,
    return
  }
  func.func @transform_0(%arg0: i32) -> (i32, i32) {
    %c0_i32 = arith.constant 0 : i32
    %c0_i32_0 = arith.constant 0 : i32
    return %arg0, %c0_i32 : i32, i32
  }
  func.func @transform_1(%arg0: i32) -> (i32, i32) {
    %c0_i32 = arith.constant 0 : i32
    %c0_i32_0 = arith.constant 0 : i32
    %c0_i32_1 = arith.constant 0 : i32
    return %c0_i32, %c0_i32_0 : i32, i32
  }
  func.func @transform_2(%arg0: i32) -> (i32, i32) {
    %c0_i32 = arith.constant 0 : i32
    %c0_i32_0 = arith.constant 0 : i32
    %c0_i32_1 = arith.constant 0 : i32
    return %c0_i32, %c0_i32_0 : i32, i32
  }
  func.func @transform_3(%arg0: i32) -> (i32, i32) {
    %c0_i32 = arith.constant 0 : i32
    %c0_i32_0 = arith.constant 0 : i32
    %c0_i32_1 = arith.constant 0 : i32
    return %c0_i32, %c0_i32_0 : i32, i32
  }
  func.func @transform_4(%arg0: i32) -> (i32, i32) {
    %c0_i32 = arith.constant 0 : i32
    %c0_i32_0 = arith.constant 0 : i32
    %c0_i32_1 = arith.constant 0 : i32
    return %c0_i32, %c0_i32_0 : i32, i32
  }
  func.func @transform_5(%arg0: i32) -> (i32, i32) {
    %c0_i32 = arith.constant 0 : i32
    %c0_i32_0 = arith.constant 0 : i32
    %c0_i32_1 = arith.constant 0 : i32
    return %c0_i32, %c0_i32_0 : i32, i32
  }
  func.func @transform_6(%arg0: i32) -> i32 {
    %c0_i32 = arith.constant 0 : i32
    %c0_i32_0 = arith.constant 0 : i32
    return %c0_i32 : i32
  }
  func.func @transform_7(%arg0: i32) -> (i32, i32) {
    %c0_i32 = arith.constant 0 : i32
    %c0_i32_0 = arith.constant 0 : i32
    return %c0_i32, %arg0 : i32, i32
  }
}

</mosaic_0001>

<bundles_post_ra>
// kernel: tpu_custom_call.1
= control target key start
LH: loop header
LB: loop body
LE: loop exit
PB: predicated region body
PF: predicated region fallthrough
CT: control target
= control target key end

     0   :  { %s2141_s0 = inlined_call_operand.vmem [shape: f32[512,16], index: 0, kind: input, shape index: {}]   ;;  %s2142_s1 = inlined_call_operand.vmem [shape: bf16[16,256], index: 1, kind: input, shape index: {}]   ;;  %s2143_s2 = inlined_call_operand.vmem [shape: f32[1,256], index: 2, kind: input, shape index: {}]   ;;  %s2144_s3 = inlined_call_operand.vmem [shape: bf16[256,256], index: 3, kind: input, shape index: {}]   ;;  %s2145_s4 = inlined_call_operand.vmem [shape: f32[1,256], index: 4, kind: input, shape index: {}]   ;;  %s2146_s5 = inlined_call_operand.vmem [shape: f32[1,256], index: 5, kind: input, shape index: {}]   ;;  %s2147_s6 = inlined_call_operand.<no memory space> [shape: f32[1], index: 6, kind: input, shape index: {}]   ;;  %s2148_s7 = inlined_call_operand.hbm [shape: f32[1,512], index: 7, kind: output, shape index: {}]  }
   0x1   :  { %12 = sst [smem:[#allocation2]] %s2147_s6 }
   0x2   :  { %13 = vsyncpa [#allocation4], 0 }
   0x3   :  { %15 = vsyncpa [#allocation4 + $0x1], 0  ;;  %s1598_s26 = smov 0   ;;  %s1600_s27 = smov 0  }
   0x4   :  { %s1602_s28 = smov 0   ;;  %s1604_s29 = smov 0  }
   0x5 LB: > { %s1334_s6 = sadd.s32 4294967295, %s1550_s29   ;;  %s1335_s30 = sadd.s32 4294967294, %s1550_s29   ;;  %s1550_s29 = sphi %s1604_s29, %s2154_s29   ;;  %s1546_s28 = sphi %s1602_s28, %s2153_s28   ;;  %s1542_s27 = sphi %s1600_s27, %s2152_s27   ;;  %s1538_s26 = sphi %s1598_s26, %s2151_s26  }
   0x6   : > { %s1621_s8 = sadd.s32 1, %s1550_s29   ;;  %s180_s9 = sadd.s32 1, %s1546_s28 }
   0x7   : > { %s177_s10 = ssub.s32 %s1550_s29, %s1621_s8  ;;  %p190_p0 = scmp.ne.s32.totalorder %s1546_s28, %s1542_s27 }
   0x8   : > { %p178_p1 = scmp.eq.s32.totalorder %s177_s10, 0  ;;  %p191_p2 = scmp.eq.s32.totalorder %s1334_s6, 1 }
   0x9   : > { %p196_p3 = scmp.ne.s32.totalorder %s1542_s27, %s1538_s26  ;;  %p197_p4 = scmp.eq.s32.totalorder %s1335_s30, 1 }
   0xa   : > { %s1631_s11 = scalar_select %p178_p1, %s1546_s28, %s180_s9  }
   0xb   : > { %p1633_p5 = por %p191_p2, %p190_p0  ;;  %p1637_p6 = por %p197_p4, %p196_p3 }
   0xc   : > { %p1338_p7 = scmp.ge.s32.totalorder %s1550_s29, 1  ;;  %p242_p8 = scmp.lt.s32.totalorder %s1550_s29, 3 }
   0xe   : > { %p243_p9 = pnand %p1338_p7, %p242_p8 }
   0xf   : > { %s1646_s16 = sshll.u32 (!%p243_p9), %s1334_s6, 5  ;;  %s1154_s22 = sld [smem:[#allocation2]] (!%p243_p9) }
  0x10   : > { %246 = sbr.rel (%p243_p9) target bundleno = 837 (0x345), region = 48  ;;  %p275_p10 = scmp.lt.s32.totalorder (!%p243_p9), %s1646_s16, 63 }
  0x11   : > { %s1274_s10 = scalar_lea.hbm (!%p243_p9), %s2148_s7, %s1646_s16  ;;  %s1554_s18 = smov (!%p243_p9), [#allocation3]  }
  0x15   : > { %v1439_v0 = vld [vmem:[%s2142_s1 + $0x4] ss:$8 sps:$4 sm:$0xff]   ;;  %v1441_v1 = vld [vmem:[%s2142_s1] ss:$8 sps:$4 sm:$0xff]   ;;  %v1552_v2 = vmov 0   ;;  %s276_s23 = scalar_select %p275_p10, %s1646_s16, 63 }
  0x16   : > { %435 = vmatprep.mubr.bf16.mxu0 %v1552_v2  ;;  %417 = vmatprep.subr.bf16.mxu0 %v1439_v0  ;;  %v1442_v3 = vld [vmem:[%s2144_s3 + $0x74] ss:$8 sps:$4 sm:$0xff]   ;;  %v1444_v4 = vld [vmem:[%s2144_s3 + $0x70] ss:$8 sps:$4 sm:$0xff]   ;;  %v1445_v5 = vld [vmem:[%s2144_s3 + $0x64] ss:$8 sps:$4 sm:$0xff]  }
  0x17   : > { %418 = vmatpush1.bf16.msra.mxu0 %v1441_v1  ;;  %896 = vmatprep.subr.bf16.mxu1 %v1442_v3  ;;  %s1341_s6 = sshll.u32 %s276_s23, 3  ;;  %v1447_v6 = vld [vmem:[%s2144_s3 + $0x60] ss:$8 sps:$4 sm:$0xff]   ;;  %v1448_v7 = vld [vmem:[%s2144_s3 + $0x54] ss:$8 sps:$4 sm:$0xff]   ;;  %vm354_vm0 = vcmask 130048  }
  0x18   : > { %897 = vmatpush1.bf16.msra.mxu1 %v1444_v4  ;;  %s1669_s15 = scalar_lea.vmem %s2141_s0, %s1341_s6  ;;  %v1450_v11 = vld [vmem:[%s2144_s3 + $0x50] ss:$8 sps:$4 sm:$0xff]   ;;  %v1451_v12 = vld [vmem:[%s2144_s3 + $0x44] ss:$8 sps:$4 sm:$0xff]   ;;  %v1453_v15 = vld [vmem:[%s2144_s3 + $0x40] ss:$8 sps:$4 sm:$0xff]  }
  0x19   : > { %898 = vmatprep.subr.bf16.mxu1 %v1445_v5  ;;  %v282_v8 = vld [vmem:[%s1669_s15] sm:$0xff]  ;;  %v283_v9 = vld [vmem:[%s1669_s15 + $0x8] sm:$0xff]  ;;  %v284_v13 = vld [vmem:[%s1669_s15 + $0x10] sm:$0xff]  ;;  %s271_s23 = sand.u32 1, %s1542_s27  }
  0x1a   : > { %v314_v10 = vpack.c.bf16 %v283_v9, %v282_v8  ;;  %v285_v14 = vld [vmem:[%s1669_s15 + $0x18] sm:$0xff]  ;;  %v286_v17 = vld [vmem:[%s1669_s15 + $0x20] sm:$0xff]  ;;  %v287_v20 = vld [vmem:[%s1669_s15 + $0x28] sm:$0xff]  ;;  %s1339_s24 = sshll.u32 %s271_s23, 1  ;;  %s1262_s14 = scalar_lea.sflag [#allocation4], %s271_s23 }
  0x1b   : > { %v315_v16 = vpack.c.bf16 %v285_v14, %v284_v13  ;;  %v1454_v18 = vld [vmem:[%s2144_s3 + $0x34] ss:$8 sps:$4 sm:$0xff]   ;;  %v1456_v19 = vld [vmem:[%s2144_s3 + $0x30] ss:$8 sps:$4 sm:$0xff]   ;;  %v1457_v21 = vld [vmem:[%s2144_s3 + $0x24] ss:$8 sps:$4 sm:$0xff]   ;;  %v316_v23 = vpack.c.bf16 %v287_v20, %v286_v17  ;;  %v334_v20 = vlaneseq }
  0x1c   : > { %899 = vmatpush1.bf16.msra.mxu1 %v1447_v6  ;;  %1344 = vmatmul.mubr.msk.bf16.vlgmr.msra.gmra.mxu0 %vm354_vm0, %v314_v10  ;;  %v1459_v22 = vld [vmem:[%s2144_s3 + $0x20] ss:$8 sps:$4 sm:$0xff]   ;;  %v1460_v24 = vld [vmem:[%s2144_s3 + $0x14] ss:$8 sps:$4 sm:$0xff]   ;;  %v1462_v25 = vld [vmem:[%s2144_s3 + $0x10] ss:$8 sps:$4 sm:$0xff]  }
  0x1d   : > { %900 = vmatprep.subr.bf16.mxu1 %v1448_v7  ;;  %445 = vmatprep.mubr.bf16.mxu0 %v1552_v2  ;;  %v1463_v26 = vld [vmem:[%s2144_s3 + $0x4] ss:$8 sps:$4 sm:$0xff]   ;;  %v288_v27 = vld [vmem:[%s1669_s15 + $0x30] sm:$0xff]  ;;  %v289_v28 = vld [vmem:[%s1669_s15 + $0x38] sm:$0xff]  ;;  %s273_s25 = scalar_lea.vmem [#allocation3], %s1339_s24  ;;  %vm1258_vm1 = vcmp.lt.s32.totalorder %v334_v20, 256 }
  0x1e   : > { %v1465_v29 = vld [vmem:[%s2144_s3] ss:$8 sps:$4 sm:$0xff]   ;;  %v1466_v30 = vld [vmem:[%s2144_s3 + $0xf4] ss:$8 sps:$4 sm:$0xff]   ;;  %v317_v31 = vpack.c.bf16 %v289_v28, %v288_v27  ;;  %v1468_v32 = vld [vmem:[%s2144_s3 + $0xf0] ss:$8 sps:$4 sm:$0xff]  }
  0x1f   : > { %v1469_v33 = vld [vmem:[%s2144_s3 + $0xe4] ss:$8 sps:$4 sm:$0xff]   ;;  %v1471_v36 = vld [vmem:[%s2144_s3 + $0xe0] ss:$8 sps:$4 sm:$0xff]   ;;  %v1472_v38 = vld [vmem:[%s2144_s3 + $0xd4] ss:$8 sps:$4 sm:$0xff]  }
  0x20   : > { %901 = vmatpush1.bf16.msra.mxu1 %v1450_v11  ;;  %v290_v34 = vld [vmem:[%s1669_s15 + $0x40] sm:$0xff]  ;;  %v291_v35 = vld [vmem:[%s1669_s15 + $0x48] sm:$0xff]  ;;  %v1474_v39 = vld [vmem:[%s2144_s3 + $0xd0] ss:$8 sps:$4 sm:$0xff]   ;;  %s1276_s6 = sshll.u32 %s273_s25, 4  ;;  %s1277_s6 = int_to_ptr.vmem [resolvable:$true] %s1276_s6 }
  0x21   : > { %902 = vmatprep.subr.bf16.mxu1 %v1451_v12  ;;  %v318_v37 = vpack.c.bf16 %v291_v35, %v290_v34  ;;  %v1475_v40 = vld [vmem:[%s2144_s3 + $0xc4] ss:$8 sps:$4 sm:$0xff]   ;;  %v292_v41 = vld [vmem:[%s1669_s15 + $0x50] sm:$0xff]  ;;  %v293_v42 = vld [vmem:[%s1669_s15 + $0x58] sm:$0xff]  ;;  %s1490_s17 = scalar_lea.vmem %s1277_s6, 32 }
  0x22   : > { %v1477_v43 = vld [vmem:[%s2144_s3 + $0xc0] ss:$8 sps:$4 sm:$0xff]   ;;  %v319_v44 = vpack.c.bf16 %v293_v42, %v292_v41  ;;  %v1478_v45 = vld [vmem:[%s2144_s3 + $0xb4] ss:$8 sps:$4 sm:$0xff]   ;;  %v1480_v46 = vld [vmem:[%s2144_s3 + $0xb0] ss:$8 sps:$4 sm:$0xff]   ;;  %p1491_p11 = scmp.ne.s32.totalorder %s1277_s6, %s1490_s17 }
  0x23   : > { %v294_v47 = vld [vmem:[%s1669_s15 + $0x60] sm:$0xff]  ;;  %v295_v48 = vld [vmem:[%s1669_s15 + $0x68] sm:$0xff]  ;;  %v296_v50 = vld [vmem:[%s1669_s15 + $0x70] sm:$0xff] }
  0x24   : > { %903 = vmatpush1.bf16.msra.mxu1 %v1453_v15  ;;  %1345 = vmatmul.mubr.msk.bf16.gmra.mxu0 %vm354_vm0, %v315_v16  ;;  %v320_v49 = vpack.c.bf16 %v295_v48, %v294_v47  ;;  %v297_v51 = vld [vmem:[%s1669_s15 + $0x78] sm:$0xff]  ;;  %v298_v53 = vld [vmem:[%s1669_s15 + $0x80] sm:$0xff]  ;;  %v299_v54 = vld [vmem:[%s1669_s15 + $0x88] sm:$0xff]  ;;  %p1492_p12 = pnand %p1491_p11, %p1633_p5 }
  0x25   : > { %455 = vmatprep.mubr.bf16.mxu0 %v1552_v2  ;;  %904 = vmatprep.subr.bf16.mxu1 %v1454_v18  ;;  %v321_v52 = vpack.c.bf16 %v297_v51, %v296_v50  ;;  %v322_v55 = vpack.c.bf16 %v299_v54, %v298_v53  ;;  %v1481_v56 = vld [vmem:[%s2144_s3 + $0xa4] ss:$8 sps:$4 sm:$0xff]   ;;  %v300_v57 = vld [vmem:[%s1669_s15 + $0x90] sm:$0xff]  ;;  %v301_v58 = vld [vmem:[%s1669_s15 + $0x98] sm:$0xff] }
  0x26   : > { %v1483_v59 = vld [vmem:[%s2144_s3 + $0xa0] ss:$8 sps:$4 sm:$0xff]   ;;  %v323_v60 = vpack.c.bf16 %v301_v58, %v300_v57  ;;  %v1484_v61 = vld [vmem:[%s2144_s3 + $0x94] ss:$8 sps:$4 sm:$0xff]   ;;  %v1486_v62 = vld [vmem:[%s2144_s3 + $0x90] ss:$8 sps:$4 sm:$0xff]   ;;  %p1493_p13 = pneg %p1492_p12 }
  0x27   : > { %v1487_v63 = vld [vmem:[%s2144_s3 + $0x84] ss:$8 sps:$4 sm:$0xff]   ;;  %v1489_v3 = vld [vmem:[%s2144_s3 + $0x80] ss:$8 sps:$4 sm:$0xff]   ;;  %v304_v5 = vld [vmem:[%s1669_s15 + $0xb0] sm:$0xff] }
  0x28   : > { %905 = vmatpush1.bf16.msra.mxu1 %v1456_v19  ;;  %v302_v0 = vld [vmem:[%s1669_s15 + $0xa0] sm:$0xff]  ;;  %v303_v1 = vld [vmem:[%s1669_s15 + $0xa8] sm:$0xff]  ;;  %v305_v6 = vld [vmem:[%s1669_s15 + $0xb8] sm:$0xff] }
  0x29   : > { %906 = vmatprep.subr.bf16.mxu1 %v1457_v21  ;;  %v324_v4 = vpack.c.bf16 %v303_v1, %v302_v0  ;;  %v325_v7 = vpack.c.bf16 %v305_v6, %v304_v5  ;;  %v306_v8 = vld [vmem:[%s1669_s15 + $0xc0] sm:$0xff]  ;;  %v307_v9 = vld [vmem:[%s1669_s15 + $0xc8] sm:$0xff]  ;;  %v308_v11 = vld [vmem:[%s1669_s15 + $0xd0] sm:$0xff]  ;;  %v1819_v21 = vshrl.u32 %v334_v20, 7 }
  0x2a   : > { %v326_v10 = vpack.c.bf16 %v307_v9, %v306_v8  ;;  %v309_v12 = vld [vmem:[%s1669_s15 + $0xd8] sm:$0xff]  ;;  %v310_v14 = vld [vmem:[%s1669_s15 + $0xe0] sm:$0xff]  ;;  %v311_v15 = vld [vmem:[%s1669_s15 + $0xe8] sm:$0xff] }
  0x2b   : > { %v327_v13 = vpack.c.bf16 %v309_v12, %v308_v11  ;;  %v328_v16 = vpack.c.bf16 %v311_v15, %v310_v14  ;;  %v312_v17 = vld [vmem:[%s1669_s15 + $0xf0] sm:$0xff]  ;;  %v313_v18 = vld [vmem:[%s1669_s15 + $0xf8] sm:$0xff]  ;;  %s1494_s15 = sshll.u32 %s1554_s18, 4  ;;  %s1495_s15 = int_to_ptr.vmem [resolvable:$false] %s1494_s15 }
  0x2c   : > { %907 = vmatpush1.bf16.msra.mxu1 %v1459_v22  ;;  %1346 = vmatmul.mubr.msk.bf16.gmra.mxu0 %vm354_vm0, %v316_v23  ;;  %v329_v19 = vpack.c.bf16 %v313_v18, %v312_v17  ;;  %v1822_v22 = vsub.s32 1, %v1819_v21  ;;  %v1825_v23 = vsub.s32 0, %v1819_v21  ;;  %s1496_s19 = scalar_lea.vmem %s1495_s15, 64  ;;  %p1497_p0 = scmp.lt.s32.totalorder %s1277_s6, %s1495_s15 }
  0x2d   : > { %908 = vmatprep.subr.bf16.mxu1 %v1460_v24  ;;  %465 = vmatprep.mubr.bf16.mxu0 %v1552_v2  ;;  %v332_v24 = vld [vmem:[%s2143_s2] sm:$0x3]  ;;  %p1498_p1 = scmp.lt.s32.totalorder %s1496_s19, %s1490_s17 }
  0x2f   : > { %p1499_p2 = por %p1498_p1, %p1497_p0 }
  0x30   : > { %909 = vmatpush1.bf16.msra.mxu1 %v1462_v25  ;;  %v1831_v25 = vrot.slane %v332_v24, %v1822_v22 }
  0x31   : > { %910 = vmatprep.subr.bf16.mxu1 %v1463_v26  ;;  %v1834_v26 = vrot.slane %v332_v24, %v1825_v23  ;;  %p1500_p3 = pnand %p1499_p2, %p1493_p13 }
  0x34   : > { %911 = vmatpush1.bf16.msra.mxu1 %v1465_v29  ;;  %1347 = vmatmul.mubr.msk.bf16.gmra.mxu0 %vm354_vm0, %v317_v31 }
  0x35   : > { %912 = vmatprep.subr.bf16.mxu1 %v1466_v30  ;;  %475 = vmatprep.mubr.bf16.mxu0 %v1552_v2 }
  0x38   : > { %913 = vmatpush2.bf16.msra.mxu1 %v1468_v32 }
  0x39   : > { %914 = vmatprep.subr.bf16.mxu1 %v1469_v33 }
  0x3c   : > { %915 = vmatpush2.bf16.msra.mxu1 %v1471_v36  ;;  %1348 = vmatmul.mubr.msk.bf16.gmra.mxu0 %vm354_vm0, %v318_v37 }
  0x3d   : > { %916 = vmatprep.subr.bf16.mxu1 %v1472_v38  ;;  %485 = vmatprep.mubr.bf16.mxu0 %v1552_v2 }
  0x40   : > { %917 = vmatpush2.bf16.msra.mxu1 %v1474_v39 }
  0x41   : > { %918 = vmatprep.subr.bf16.mxu1 %v1475_v40 }
  0x44   : > { %919 = vmatpush2.bf16.msra.mxu1 %v1477_v43  ;;  %1349 = vmatmul.mubr.msk.bf16.gmra.mxu0 %vm354_vm0, %v319_v44 }
  0x45   : > { %920 = vmatprep.subr.bf16.mxu1 %v1478_v45  ;;  %495 = vmatprep.mubr.bf16.mxu0 %v1552_v2 }
  0x48   : > { %921 = vmatpush2.bf16.msra.mxu1 %v1480_v46 }
  0x49   : > { %922 = vmatprep.subr.bf16.mxu1 %v1481_v56 }
  0x4c   : > { %1350 = vmatmul.mubr.msk.bf16.gmra.mxu0 %vm354_vm0, %v320_v49  ;;  %923 = vmatpush2.bf16.msra.mxu1 %v1483_v59 }
  0x4d   : > { %505 = vmatprep.mubr.bf16.mxu0 %v1552_v2  ;;  %924 = vmatprep.subr.bf16.mxu1 %v1484_v61 }
  0x50   : > { %925 = vmatpush2.bf16.msra.mxu1 %v1486_v62 }
  0x51   : > { %926 = vmatprep.subr.bf16.mxu1 %v1487_v63 }
  0x54   : > { %1351 = vmatmul.mubr.msk.bf16.gmra.mxu0 %vm354_vm0, %v321_v52  ;;  %927 = vmatpush2.bf16.msra.mxu1 %v1489_v3 }
  0x55   : > { %515 = vmatprep.mubr.bf16.mxu0 %v1552_v2 }
  0x5c   : > { %1352 = vmatmul.mubr.msk.bf16.gmra.mxu0 %vm354_vm0, %v322_v55 }
  0x5d   : > { %525 = vmatprep.mubr.bf16.mxu0 %v1552_v2 }
  0x64   : > { %1353 = vmatmul.mubr.msk.bf16.gmra.mxu0 %vm354_vm0, %v323_v60 }
  0x65   : > { %535 = vmatprep.mubr.bf16.mxu0 %v1552_v2 }
  0x6c   : > { %1354 = vmatmul.mubr.msk.bf16.gmra.mxu0 %vm354_vm0, %v324_v4 }
  0x6d   : > { %545 = vmatprep.mubr.bf16.mxu0 %v1552_v2 }
  0x74   : > { %1355 = vmatmul.mubr.msk.bf16.gmra.mxu0 %vm354_vm0, %v325_v7 }
  0x75   : > { %555 = vmatprep.mubr.bf16.mxu0 %v1552_v2 }
  0x7c   : > { %1356 = vmatmul.mubr.msk.bf16.gmra.mxu0 %vm354_vm0, %v326_v10 }
  0x7d   : > { %565 = vmatprep.mubr.bf16.mxu0 %v1552_v2 }
  0x84   : > { %1357 = vmatmul.mubr.msk.bf16.gmra.mxu0 %vm354_vm0, %v327_v13 }
  0x85   : > { %575 = vmatprep.mubr.bf16.mxu0 %v1552_v2 }
  0x8c   : > { %1358 = vmatmul.mubr.msk.bf16.gmra.mxu0 %vm354_vm0, %v328_v16 }
  0x8d   : > { %585 = vmatprep.mubr.bf16.mxu0 %v1552_v2 }
  0x94   : > { %1359 = vmatmul.mubr.msk.bf16.gmra.mxu0 %vm354_vm0, %v329_v19 }
  0xdc   : > { %v437_v2 = vpop.f32.mrf.mxu0 }
  0xdd   : > { %v438_v31 = vadd.f32 %v437_v2, %v1834_v26 }
  0xde   : > { %v439_v27 = vpop.f32.mrf.mxu0 }
  0xdf   : > { %v440_v29 = vadd.f32 %v439_v27, %v1831_v25  ;;  %v596_v38 = vmax.f32 %v438_v31, 0.0 }
  0xe0   : > { %v441_v28 = vpop.f32.mrf.mxu0 }
  0xe1   : > { %v442_v30 = vadd.f32 %v441_v28, %v1834_v26  ;;  %v597_v36 = vmax.f32 %v440_v29, 0.0 }
  0xe2   : > { %v443_v32 = vpop.f32.mrf.mxu0 }
  0xe3   : > { %v444_v33 = vadd.f32 %v443_v32, %v1831_v25  ;;  %v598_v34 = vmax.f32 %v442_v30, 0.0 }
  0xe4   : > { %v447_v35 = vpop.f32.mrf.mxu0 }
  0xe5   : > { %v599_v37 = vmax.f32 %v444_v33, 0.0  ;;  %v660_v41 = vpack.c.bf16 %v598_v34, %v596_v38  ;;  %v448_v45 = vadd.f32 %v447_v35, %v1834_v26 }
  0xe6   : > { %v449_v39 = vpop.f32.mrf.mxu0 }
  0xe7   : > { %v661_v40 = vpack.c.bf16 %v599_v37, %v597_v36  ;;  %v450_v43 = vadd.f32 %v449_v39, %v1831_v25  ;;  %v600_v52 = vmax.f32 %v448_v45, 0.0 }
  0xe8   : > { %v451_v42 = vpop.f32.mrf.mxu0 }
  0xe9   : > { %v452_v44 = vadd.f32 %v451_v42, %v1834_v26  ;;  %928 = vmatprep.mubr.bf16.mxu1 %v661_v40  ;;  %v601_v50 = vmax.f32 %v450_v43, 0.0 }
  0xea   : > { %v453_v46 = vpop.f32.mrf.mxu0  ;;  %929 = vmatmul.mubr.bf16.vlgmr.msra.gmra.mxu1 %v660_v41 }
  0xeb   : > { %v454_v47 = vadd.f32 %v453_v46, %v1831_v25  ;;  %v602_v48 = vmax.f32 %v452_v44, 0.0 }
  0xec   : > { %v457_v49 = vpop.f32.mrf.mxu0 }
  0xed   : > { %v603_v51 = vmax.f32 %v454_v47, 0.0  ;;  %v662_v55 = vpack.c.bf16 %v602_v48, %v600_v52  ;;  %v458_v59 = vadd.f32 %v457_v49, %v1834_v26 }
  0xee   : > { %v459_v53 = vpop.f32.mrf.mxu0 }
  0xef   : > { %v663_v54 = vpack.c.bf16 %v603_v51, %v601_v50  ;;  %v460_v57 = vadd.f32 %v459_v53, %v1831_v25  ;;  %v604_v3 = vmax.f32 %v458_v59, 0.0 }
  0xf0   : > { %v461_v56 = vpop.f32.mrf.mxu0 }
  0xf1   : > { %v462_v58 = vadd.f32 %v461_v56, %v1834_v26  ;;  %938 = vmatprep.mubr.bf16.mxu1 %v663_v54  ;;  %v605_v0 = vmax.f32 %v460_v57, 0.0 }
  0xf2   : > { %v463_v60 = vpop.f32.mrf.mxu0  ;;  %939 = vmatmul.mubr.bf16.gmra.mxu1 %v662_v55 }
  0xf3   : > { %v464_v61 = vadd.f32 %v463_v60, %v1831_v25  ;;  %v606_v62 = vmax.f32 %v462_v58, 0.0 }
  0xf4   : > { %v467_v63 = vpop.f32.mrf.mxu0 }
  0xf5   : > { %v607_v1 = vmax.f32 %v464_v61, 0.0  ;;  %v664_v6 = vpack.c.bf16 %v606_v62, %v604_v3  ;;  %v468_v10 = vadd.f32 %v467_v63, %v1834_v26 }
  0xf6   : > { %v469_v4 = vpop.f32.mrf.mxu0 }
  0xf7   : > { %v665_v5 = vpack.c.bf16 %v607_v1, %v605_v0  ;;  %v470_v8 = vadd.f32 %v469_v4, %v1831_v25  ;;  %v608_v17 = vmax.f32 %v468_v10, 0.0 }
  0xf8   : > { %v471_v7 = vpop.f32.mrf.mxu0 }
  0xf9   : > { %v472_v9 = vadd.f32 %v471_v7, %v1834_v26  ;;  %948 = vmatprep.mubr.bf16.mxu1 %v665_v5  ;;  %v609_v15 = vmax.f32 %v470_v8, 0.0 }
  0xfa   : > { %v473_v11 = vpop.f32.mrf.mxu0  ;;  %949 = vmatmul.mubr.bf16.gmra.mxu1 %v664_v6 }
  0xfb   : > { %v474_v12 = vadd.f32 %v473_v11, %v1831_v25  ;;  %v610_v13 = vmax.f32 %v472_v9, 0.0 }
  0xfc   : > { %v477_v14 = vpop.f32.mrf.mxu0 }
  0xfd   : > { %v611_v16 = vmax.f32 %v474_v12, 0.0  ;;  %v666_v24 = vpack.c.bf16 %v610_v13, %v608_v17  ;;  %v478_v29 = vadd.f32 %v477_v14, %v1834_v26 }
  0xfe   : > { %v479_v18 = vpop.f32.mrf.mxu0 }
  0xff   : > { %v667_v19 = vpack.c.bf16 %v611_v16, %v609_v15  ;;  %v480_v27 = vadd.f32 %v479_v18, %v1831_v25  ;;  %v612_v36 = vmax.f32 %v478_v29, 0.0 }
 0x100   : > { %v481_v2 = vpop.f32.mrf.mxu0 }
 0x101   : > { %v482_v28 = vadd.f32 %v481_v2, %v1834_v26  ;;  %958 = vmatprep.mubr.bf16.mxu1 %v667_v19  ;;  %v613_v34 = vmax.f32 %v480_v27, 0.0 }
 0x102   : > { %v483_v30 = vpop.f32.mrf.mxu0  ;;  %959 = vmatmul.mubr.bf16.gmra.mxu1 %v666_v24 }
 0x103   : > { %v484_v31 = vadd.f32 %v483_v30, %v1831_v25  ;;  %v614_v32 = vmax.f32 %v482_v28, 0.0 }
 0x104   : > { %v487_v33 = vpop.f32.mrf.mxu0 }
 0x105   : > { %v615_v35 = vmax.f32 %v484_v31, 0.0  ;;  %v668_v39 = vpack.c.bf16 %v614_v32, %v612_v36  ;;  %v488_v43 = vadd.f32 %v487_v33, %v1834_v26 }
 0x106   : > { %v489_v37 = vpop.f32.mrf.mxu0 }
 0x107   : > { %v669_v38 = vpack.c.bf16 %v615_v35, %v613_v34  ;;  %v490_v41 = vadd.f32 %v489_v37, %v1831_v25  ;;  %v616_v50 = vmax.f32 %v488_v43, 0.0 }
 0x108   : > { %v491_v40 = vpop.f32.mrf.mxu0 }
 0x109   : > { %v492_v42 = vadd.f32 %v491_v40, %v1834_v26  ;;  %968 = vmatprep.mubr.bf16.mxu1 %v669_v38  ;;  %v617_v48 = vmax.f32 %v490_v41, 0.0 }
 0x10a   : > { %v493_v44 = vpop.f32.mrf.mxu0  ;;  %969 = vmatmul.mubr.bf16.gmra.mxu1 %v668_v39 }
 0x10b   : > { %v494_v45 = vadd.f32 %v493_v44, %v1831_v25  ;;  %v618_v46 = vmax.f32 %v492_v42, 0.0 }
 0x10c   : > { %v497_v47 = vpop.f32.mrf.mxu0 }
 0x10d   : > { %v619_v49 = vmax.f32 %v494_v45, 0.0  ;;  %v670_v53 = vpack.c.bf16 %v618_v46, %v616_v50  ;;  %v498_v57 = vadd.f32 %v497_v47, %v1834_v26 }
 0x10e   : > { %v499_v51 = vpop.f32.mrf.mxu0 }
 0x10f   : > { %v671_v52 = vpack.c.bf16 %v619_v49, %v617_v48  ;;  %v500_v55 = vadd.f32 %v499_v51, %v1831_v25  ;;  %v620_v0 = vmax.f32 %v498_v57, 0.0 }
 0x110   : > { %v501_v54 = vpop.f32.mrf.mxu0 }
 0x111   : > { %v502_v56 = vadd.f32 %v501_v54, %v1834_v26  ;;  %978 = vmatprep.mubr.bf16.mxu1 %v671_v52  ;;  %v621_v62 = vmax.f32 %v500_v55, 0.0 }
 0x112   : > { %v503_v58 = vpop.f32.mrf.mxu0  ;;  %979 = vmatmul.mubr.bf16.gmra.mxu1 %v670_v53 }
 0x113   : > { %v504_v59 = vadd.f32 %v503_v58, %v1831_v25  ;;  %v622_v60 = vmax.f32 %v502_v56, 0.0 }
 0x114   : > { %v507_v61 = vpop.f32.mrf.mxu0 }
 0x115   : > { %v623_v63 = vmax.f32 %v504_v59, 0.0  ;;  %v672_v4 = vpack.c.bf16 %v622_v60, %v620_v0  ;;  %v508_v8 = vadd.f32 %v507_v61, %v1834_v26 }
 0x116   : > { %v509_v1 = vpop.f32.mrf.mxu0 }
 0x117   : > { %v673_v3 = vpack.c.bf16 %v623_v63, %v621_v62  ;;  %v510_v6 = vadd.f32 %v509_v1, %v1831_v25  ;;  %v624_v15 = vmax.f32 %v508_v8, 0.0 }
 0x118   : > { %v511_v5 = vpop.f32.mrf.mxu0 }
 0x119   : > { %v512_v7 = vadd.f32 %v511_v5, %v1834_v26  ;;  %988 = vmatprep.mubr.bf16.mxu1 %v673_v3  ;;  %v625_v13 = vmax.f32 %v510_v6, 0.0 }
 0x11a   : > { %v513_v9 = vpop.f32.mrf.mxu0  ;;  %989 = vmatmul.mubr.bf16.gmra.mxu1 %v672_v4 }
 0x11b   : > { %v514_v10 = vadd.f32 %v513_v9, %v1831_v25  ;;  %v626_v11 = vmax.f32 %v512_v7, 0.0 }
 0x11c   : > { %v517_v12 = vpop.f32.mrf.mxu0 }
 0x11d   : > { %v627_v14 = vmax.f32 %v514_v10, 0.0  ;;  %v674_v18 = vpack.c.bf16 %v626_v11, %v624_v15  ;;  %v518_v27 = vadd.f32 %v517_v12, %v1834_v26 }
 0x11e   : > { %v519_v16 = vpop.f32.mrf.mxu0 }
 0x11f   : > { %v675_v17 = vpack.c.bf16 %v627_v14, %v625_v13  ;;  %v520_v24 = vadd.f32 %v519_v16, %v1831_v25  ;;  %v628_v34 = vmax.f32 %v518_v27, 0.0 }
 0x120   : > { %v521_v19 = vpop.f32.mrf.mxu0 }
 0x121   : > { %v522_v2 = vadd.f32 %v521_v19, %v1834_v26  ;;  %998 = vmatprep.mubr.bf16.mxu1 %v675_v17  ;;  %v629_v32 = vmax.f32 %v520_v24, 0.0 }
 0x122   : > { %v523_v28 = vpop.f32.mrf.mxu0  ;;  %999 = vmatmul.mubr.bf16.gmra.mxu1 %v674_v18 }
 0x123   : > { %v524_v29 = vadd.f32 %v523_v28, %v1831_v25  ;;  %v630_v30 = vmax.f32 %v522_v2, 0.0 }
 0x124   : > { %v527_v31 = vpop.f32.mrf.mxu0 }
 0x125   : > { %v631_v33 = vmax.f32 %v524_v29, 0.0  ;;  %v676_v37 = vpack.c.bf16 %v630_v30, %v628_v34  ;;  %v528_v41 = vadd.f32 %v527_v31, %v1834_v26 }
 0x126   : > { %v529_v35 = vpop.f32.mrf.mxu0 }
 0x127   : > { %v677_v36 = vpack.c.bf16 %v631_v33, %v629_v32  ;;  %v530_v39 = vadd.f32 %v529_v35, %v1831_v25  ;;  %v632_v48 = vmax.f32 %v528_v41, 0.0 }
 0x128   : > { %v531_v38 = vpop.f32.mrf.mxu0 }
 0x129   : > { %v532_v40 = vadd.f32 %v531_v38, %v1834_v26  ;;  %1008 = vmatprep.mubr.bf16.mxu1 %v677_v36  ;;  %v633_v46 = vmax.f32 %v530_v39, 0.0 }
 0x12a   : > { %v533_v42 = vpop.f32.mrf.mxu0  ;;  %1009 = vmatmul.mubr.bf16.gmra.mxu1 %v676_v37 }
 0x12b   : > { %v534_v43 = vadd.f32 %v533_v42, %v1831_v25  ;;  %v634_v44 = vmax.f32 %v532_v40, 0.0 }
 0x12c   : > { %v537_v45 = vpop.f32.mrf.mxu0 }
 0x12d   : > { %v635_v47 = vmax.f32 %v534_v43, 0.0  ;;  %v678_v51 = vpack.c.bf16 %v634_v44, %v632_v48  ;;  %v538_v55 = vadd.f32 %v537_v45, %v1834_v26 }
 0x12e   : > { %v539_v49 = vpop.f32.mrf.mxu0 }
 0x12f   : > { %v679_v50 = vpack.c.bf16 %v635_v47, %v633_v46  ;;  %v540_v53 = vadd.f32 %v539_v49, %v1831_v25  ;;  %v636_v62 = vmax.f32 %v538_v55, 0.0 }
 0x130   : > { %v541_v52 = vpop.f32.mrf.mxu0 }
 0x131   : > { %v542_v54 = vadd.f32 %v541_v52, %v1834_v26  ;;  %1018 = vmatprep.mubr.bf16.mxu1 %v679_v50  ;;  %v637_v60 = vmax.f32 %v540_v53, 0.0 }
 0x132   : > { %v543_v56 = vpop.f32.mrf.mxu0  ;;  %1019 = vmatmul.mubr.bf16.gmra.mxu1 %v678_v51 }
 0x133   : > { %v544_v57 = vadd.f32 %v543_v56, %v1831_v25  ;;  %v638_v58 = vmax.f32 %v542_v54, 0.0 }
 0x134   : > { %v547_v59 = vpop.f32.mrf.mxu0 }
 0x135   : > { %v639_v61 = vmax.f32 %v544_v57, 0.0  ;;  %v680_v1 = vpack.c.bf16 %v638_v58, %v636_v62  ;;  %v548_v6 = vadd.f32 %v547_v59, %v1834_v26 }
 0x136   : > { %v549_v63 = vpop.f32.mrf.mxu0 }
 0x137   : > { %v681_v0 = vpack.c.bf16 %v639_v61, %v637_v60  ;;  %v550_v4 = vadd.f32 %v549_v63, %v1831_v25  ;;  %v640_v13 = vmax.f32 %v548_v6, 0.0 }
 0x138   : > { %v551_v3 = vpop.f32.mrf.mxu0 }
 0x139   : > { %v552_v5 = vadd.f32 %v551_v3, %v1834_v26  ;;  %1028 = vmatprep.mubr.bf16.mxu1 %v681_v0  ;;  %v641_v11 = vmax.f32 %v550_v4, 0.0 }
 0x13a   : > { %v553_v7 = vpop.f32.mrf.mxu0  ;;  %1029 = vmatmul.mubr.bf16.gmra.mxu1 %v680_v1 }
 0x13b   : > { %v554_v8 = vadd.f32 %v553_v7, %v1831_v25  ;;  %v642_v9 = vmax.f32 %v552_v5, 0.0 }
 0x13c   : > { %v557_v10 = vpop.f32.mrf.mxu0 }
 0x13d   : > { %v643_v12 = vmax.f32 %v554_v8, 0.0  ;;  %v682_v16 = vpack.c.bf16 %v642_v9, %v640_v13  ;;  %v558_v24 = vadd.f32 %v557_v10, %v1834_v26 }
 0x13e   : > { %v559_v14 = vpop.f32.mrf.mxu0 }
 0x13f   : > { %v683_v15 = vpack.c.bf16 %v643_v12, %v641_v11  ;;  %v560_v18 = vadd.f32 %v559_v14, %v1831_v25  ;;  %v644_v32 = vmax.f32 %v558_v24, 0.0 }
 0x140   : > { %v561_v17 = vpop.f32.mrf.mxu0 }
 0x141   : > { %v562_v19 = vadd.f32 %v561_v17, %v1834_v26  ;;  %1038 = vmatprep.mubr.bf16.mxu1 %v683_v15  ;;  %v645_v30 = vmax.f32 %v560_v18, 0.0 }
 0x142   : > { %v563_v2 = vpop.f32.mrf.mxu0  ;;  %1039 = vmatmul.mubr.bf16.gmra.mxu1 %v682_v16 }
 0x143   : > { %v564_v27 = vadd.f32 %v563_v2, %v1831_v25  ;;  %v646_v28 = vmax.f32 %v562_v19, 0.0 }
 0x144   : > { %v567_v29 = vpop.f32.mrf.mxu0 }
 0x145   : > { %v647_v31 = vmax.f32 %v564_v27, 0.0  ;;  %v684_v35 = vpack.c.bf16 %v646_v28, %v644_v32  ;;  %v568_v39 = vadd.f32 %v567_v29, %v1834_v26 }
 0x146   : > { %v569_v33 = vpop.f32.mrf.mxu0 }
 0x147   : > { %v685_v34 = vpack.c.bf16 %v647_v31, %v645_v30  ;;  %v570_v37 = vadd.f32 %v569_v33, %v1831_v25  ;;  %v648_v46 = vmax.f32 %v568_v39, 0.0 }
 0x148   : > { %v571_v36 = vpop.f32.mrf.mxu0 }
 0x149   : > { %v572_v38 = vadd.f32 %v571_v36, %v1834_v26  ;;  %1048 = vmatprep.mubr.bf16.mxu1 %v685_v34  ;;  %v649_v44 = vmax.f32 %v570_v37, 0.0 }
 0x14a   : > { %v573_v40 = vpop.f32.mrf.mxu0  ;;  %1049 = vmatmul.mubr.bf16.gmra.mxu1 %v684_v35 }
 0x14b   : > { %v574_v41 = vadd.f32 %v573_v40, %v1831_v25  ;;  %v650_v42 = vmax.f32 %v572_v38, 0.0 }
 0x14c   : > { %v577_v43 = vpop.f32.mrf.mxu0 }
 0x14d   : > { %v651_v45 = vmax.f32 %v574_v41, 0.0  ;;  %v686_v49 = vpack.c.bf16 %v650_v42, %v648_v46  ;;  %v578_v53 = vadd.f32 %v577_v43, %v1834_v26 }
 0x14e   : > { %v579_v47 = vpop.f32.mrf.mxu0 }
 0x14f   : > { %v687_v48 = vpack.c.bf16 %v651_v45, %v649_v44  ;;  %v580_v51 = vadd.f32 %v579_v47, %v1831_v25  ;;  %v652_v60 = vmax.f32 %v578_v53, 0.0  ;;  %v724_v45 = vld [vmem:[%s2145_s4] sm:$0x3] }
 0x150   : > { %v581_v50 = vpop.f32.mrf.mxu0  ;;  %v1942_v47 = vrot.slane %v724_v45, %v1825_v23 }
 0x151   : > { %v582_v52 = vadd.f32 %v581_v50, %v1834_v26  ;;  %1058 = vmatprep.mubr.bf16.mxu1 %v687_v48  ;;  %v653_v58 = vmax.f32 %v580_v51, 0.0 }
 0x152   : > { %v583_v54 = vpop.f32.mrf.mxu0  ;;  %1059 = vmatmul.mubr.bf16.gmra.mxu1 %v686_v49  ;;  %v1945_v49 = vrot.slane %v724_v45, %v1822_v22 }
 0x153   : > { %v584_v55 = vadd.f32 %v583_v54, %v1831_v25  ;;  %v654_v56 = vmax.f32 %v582_v52, 0.0  ;;  %v1953_v54 = vld [vmem:[%s2146_s5] sm:$0x3] }
 0x154   : > { %v587_v57 = vpop.f32.mrf.mxu0 }
 0x155   : > { %v655_v59 = vmax.f32 %v584_v55, 0.0  ;;  %v688_v63 = vpack.c.bf16 %v654_v56, %v652_v60  ;;  %v588_v4 = vadd.f32 %v587_v57, %v1834_v26  ;;  %v1164_v56 = vrot.slane %v1953_v54, %v1822_v22 }
 0x156   : > { %v589_v61 = vpop.f32.mrf.mxu0 }
 0x157   : > { %v689_v62 = vpack.c.bf16 %v655_v59, %v653_v58  ;;  %v590_v1 = vadd.f32 %v589_v61, %v1831_v25  ;;  %v656_v10 = vmax.f32 %v588_v4, 0.0  ;;  %1231 = vmatprep.mubr.f32.mxu0 %v1164_v56 }
 0x158   : > { %v591_v0 = vpop.f32.mrf.mxu0 }
 0x159   : > { %v592_v3 = vadd.f32 %v591_v0, %v1834_v26  ;;  %1068 = vmatprep.mubr.bf16.mxu1 %v689_v62  ;;  %v657_v8 = vmax.f32 %v590_v1, 0.0 }
 0x15a   : > { %v593_v5 = vpop.f32.mrf.mxu0  ;;  %1069 = vmatmul.mubr.bf16.gmra.mxu1 %v688_v63 }
 0x15b   : > { %v594_v6 = vadd.f32 %v593_v5, %v1831_v25  ;;  %v658_v7 = vmax.f32 %v592_v3, 0.0 }
 0x15d   : > { %v659_v9 = vmax.f32 %v594_v6, 0.0  ;;  %v690_v12 = vpack.c.bf16 %v658_v7, %v656_v10 }
 0x15f   : > { %v691_v11 = vpack.c.bf16 %v659_v9, %v657_v8 }
 0x161   : > { %1078 = vmatprep.mubr.bf16.mxu1 %v691_v11 }
 0x162   : > { %1079 = vmatmul.mubr.bf16.gmra.mxu1 %v690_v12 }
 0x1aa   : > { %v1900_v13 = vpop.f32.mrf.mxu1 }
 0x1ac   : > { %v1902_v14 = vpop.f32.mrf.mxu1 }
 0x1ae   : > { %v1904_v15 = vpop.f32.mrf.mxu1 }
 0x1b0   : > { %v1906_v16 = vpop.f32.mrf.mxu1 }
 0x1b2   : > { %v1908_v26 = vpop.f32.mrf.mxu1 }
 0x1b4   : > { %v1910_v17 = vpop.f32.mrf.mxu1 }
 0x1b6   : > { %v1912_v25 = vpop.f32.mrf.mxu1 }
 0x1b8   : > { %v1914_v18 = vpop.f32.mrf.mxu1 }
 0x1ba   : > { %v1916_v19 = vpop.f32.mrf.mxu1 }
 0x1bc   : > { %v1918_v24 = vpop.f32.mrf.mxu1 }
 0x1be   : > { %v1920_v2 = vpop.f32.mrf.mxu1 }
 0x1c0   : > { %v1922_v27 = vpop.f32.mrf.mxu1 }
 0x1c2   : > { %v1924_v28 = vpop.f32.mrf.mxu1 }
 0x1c4   : > { %v1926_v29 = vpop.f32.mrf.mxu1 }
 0x1c6   : > { %v1928_v30 = vpop.f32.mrf.mxu1 }
 0x1c8   : > { %v1930_v31 = vpop.f32.mrf.mxu1 }
 0x1ca   : > { %v1932_v32 = vpop.f32.mrf.mxu1 }
 0x1cc   : > { %v1934_v33 = vpop.f32.mrf.mxu1 }
 0x1ce   : > { %v1936_v34 = vpop.f32.mrf.mxu1 }
 0x1d0   : > { %v976_v35 = vpop.f32.mrf.mxu1 }
 0x1d2   : > { %v980_v36 = vpop.f32.mrf.mxu1 }
 0x1d4   : > { %v982_v37 = vpop.f32.mrf.mxu1 }
 0x1d6   : > { %v984_v38 = vpop.f32.mrf.mxu1 }
 0x1d7   : > { %v985_v12 = vadd.f32 %v984_v38, %v1942_v47 }
 0x1d8   : > { %v986_v39 = vpop.f32.mrf.mxu1 }
 0x1d9   : > { %v987_v9 = vadd.f32 %v986_v39, %v1945_v49  ;;  %v1111_v39 = vmax.f32 %v985_v12, 0.0 }
 0x1da   : > { %v990_v40 = vpop.f32.mrf.mxu1 }
 0x1db   : > { %v991_v6 = vadd.f32 %v990_v40, %v1942_v47  ;;  %v981_v40 = vadd.f32 %v980_v36, %v1942_v47 }
 0x1dc   : > { %v992_v41 = vpop.f32.mrf.mxu1 }
 0x1dd   : > { %v993_v22 = vadd.f32 %v992_v41, %v1945_v49  ;;  %v1113_v41 = vmax.f32 %v991_v6, 0.0  ;;  %v1109_v38 = vmax.f32 %v981_v40, 0.0 }
 0x1de   : > { %v994_v42 = vpop.f32.mrf.mxu1 }
 0x1df   : > { %v995_v0 = vadd.f32 %v994_v42, %v1942_v47  ;;  %v1114_v10 = vmax.f32 %v993_v22, 0.0 }
 0x1e0   : > { %v996_v43 = vpop.f32.mrf.mxu1 }
 0x1e1   : > { %v997_v61 = vadd.f32 %v996_v43, %v1945_v49  ;;  %v1115_v7 = vmax.f32 %v995_v0, 0.0  ;;  %v983_v43 = vadd.f32 %v982_v37, %v1945_v49  ;;  %v975_v37 = vadd.f32 %v1936_v34, %v1942_v47 }
 0x1e2   : > { %v1000_v44 = vpop.f32.mrf.mxu1  ;;  %v967_v34 = vadd.f32 %v1930_v31, %v1945_v49  ;;  %v961_v31 = vadd.f32 %v1924_v28, %v1942_v47  ;;  %v953_v28 = vadd.f32 %v1918_v24, %v1945_v49  ;;  %v945_v24 = vadd.f32 %v1912_v25, %v1942_v47 }
 0x1e3   : > { %v1001_v58 = vadd.f32 %v1000_v44, %v1942_v47  ;;  %v1116_v4 = vmax.f32 %v997_v61, 0.0  ;;  %v1112_v44 = vmax.f32 %v987_v9, 0.0  ;;  %v935_v25 = vadd.f32 %v1904_v15, %v1942_v47 }
 0x1e4   : > { %v1002_v46 = vpop.f32.mrf.mxu1 }
 0x1e5   : > { %v1003_v52 = vadd.f32 %v1002_v46, %v1945_v49  ;;  %v1117_v1 = vmax.f32 %v1001_v58, 0.0 }
 0x1e6   : > { %v1004_v48 = vpop.f32.mrf.mxu1 }
 0x1e7   : > { %v1005_v50 = vadd.f32 %v1004_v48, %v1942_v47  ;;  %v1118_v62 = vmax.f32 %v1003_v52, 0.0  ;;  %v977_v48 = vadd.f32 %v976_v35, %v1945_v49  ;;  %v971_v35 = vadd.f32 %v1932_v32, %v1942_v47 }
 0x1e8   : > { %v1006_v51 = vpop.f32.mrf.mxu1  ;;  %v963_v32 = vadd.f32 %v1926_v29, %v1945_v49  ;;  %v955_v29 = vadd.f32 %v1920_v2, %v1942_v47  ;;  %v947_v2 = vadd.f32 %v1914_v18, %v1945_v49  ;;  %v1095_v18 = vmax.f32 %v945_v24, 0.0 }
 0x1e9   : > { %v1007_v53 = vadd.f32 %v1006_v51, %v1945_v49  ;;  %v1119_v59 = vmax.f32 %v1005_v50, 0.0  ;;  %v1110_v50 = vmax.f32 %v983_v43, 0.0  ;;  %v1108_v36 = vmax.f32 %v977_v48, 0.0 }
 0x1ea   : > { %v1955_v55 = vpop.f32.mrf.mxu1 }
 0x1eb   : > { %v1120_v57 = vmax.f32 %v1007_v53, 0.0  ;;  %v973_v53 = vadd.f32 %v1934_v33, %v1945_v49  ;;  %v965_v33 = vadd.f32 %v1928_v30, %v1942_v47  ;;  %v957_v30 = vadd.f32 %v1922_v27, %v1945_v49 }
 0x1ec   : > { %v1960_v60 = vpop.f32.mrf.mxu1  ;;  %v951_v27 = vadd.f32 %v1916_v19, %v1942_v47 }
 0x1ed   : > { %1167 = vmatprep.subr.mxu0 %v1120_v57  ;;  %v1107_v57 = vmax.f32 %v975_v37, 0.0 }
 0x1ee   : > { %v1963_v63 = vpop.f32.mrf.mxu1  ;;  %1168 = vmatpush1.xpose.msra.mxu0 %v1119_v59  ;;  %v1106_v59 = vmax.f32 %v973_v53, 0.0  ;;  %v1096_v53 = vmax.f32 %v947_v2, 0.0 }
 0x1ef   : > { %1169 = vmatprep.subr.mxu0 %v1118_v62  ;;  %v1105_v62 = vmax.f32 %v971_v35, 0.0 }
 0x1f0   : > { %v1966_v3 = vpop.f32.mrf.mxu1 }
 0x1f2   : > { %v1969_v5 = vpop.f32.mrf.mxu1  ;;  %1170 = vmatpush1.xpose.msra.mxu0 %v1117_v1  ;;  %v1104_v1 = vmax.f32 %v967_v34, 0.0 }
 0x1f3   : > { %1171 = vmatprep.subr.mxu0 %v1116_v4  ;;  %v1103_v4 = vmax.f32 %v965_v33, 0.0 }
 0x1f4   : > { %v1972_v8 = vpop.f32.mrf.mxu1 }
 0x1f6   : > { %v1975_v11 = vpop.f32.mrf.mxu1  ;;  %1172 = vmatpush1.xpose.msra.mxu0 %v1115_v7  ;;  %v1102_v7 = vmax.f32 %v963_v32, 0.0 }
 0x1f7   : > { %1173 = vmatprep.subr.mxu0 %v1114_v10  ;;  %v1101_v10 = vmax.f32 %v961_v31, 0.0 }
 0x1f8   : > { %v1978_v42 = vpop.f32.mrf.mxu1 }
 0x1fa   : > { %v1981_v45 = vpop.f32.mrf.mxu1  ;;  %1174 = vmatpush1.xpose.msra.mxu0 %v1113_v41  ;;  %v1100_v41 = vmax.f32 %v957_v30, 0.0 }
 0x1fb   : > { %1175 = vmatprep.subr.mxu0 %v1112_v44  ;;  %v1099_v44 = vmax.f32 %v955_v29, 0.0 }
 0x1fc   : > { %v1984_v46 = vpop.f32.mrf.mxu1 }
 0x1fe   : > { %v1987_v51 = vpop.f32.mrf.mxu1  ;;  %1176 = vmatpush1.xpose.msra.mxu0 %v1111_v39  ;;  %v1098_v39 = vmax.f32 %v953_v28, 0.0 }
 0x1ff   : > { %1177 = vmatprep.subr.mxu0 %v1110_v50  ;;  %v1097_v50 = vmax.f32 %v951_v27, 0.0 }
 0x200   : > { %v1991_v52 = vpop.f32.mrf.mxu1 }
 0x202   : > { %v1995_v56 = vpop.f32.mrf.mxu1  ;;  %1178 = vmatpush1.xpose.msra.mxu0 %v1109_v38  ;;  %v943_v38 = vadd.f32 %v1910_v17, %v1945_v49 }
 0x203   : > { %1179 = vmatprep.subr.mxu0 %v1108_v36  ;;  %v941_v36 = vadd.f32 %v1908_v26, %v1942_v47  ;;  %v931_v26 = vadd.f32 %v1900_v13, %v1942_v47 }
 0x204   : > { %v1999_v58 = vpop.f32.mrf.mxu1  ;;  %v1094_v34 = vmax.f32 %v943_v38, 0.0 }
 0x205   : > { %v1093_v17 = vmax.f32 %v941_v36, 0.0 }
 0x206   : > { %v2003_v61 = vpop.f32.mrf.mxu1  ;;  %1180 = vmatpush1.xpose.msra.mxu0 %v1107_v57  ;;  %v937_v57 = vadd.f32 %v1906_v16, %v1945_v49  ;;  %v1091_v16 = vmax.f32 %v935_v25, 0.0 }
 0x207   : > { %1181 = vmatprep.subr.mxu0 %v1106_v59 }
 0x208   : > { %v2007_v0 = vpop.f32.mrf.mxu1  ;;  %v1092_v32 = vmax.f32 %v937_v57, 0.0 }
 0x20a   : > { %v2011_v22 = vpop.f32.mrf.mxu1  ;;  %1182 = vmatpush1.xpose.msra.mxu0 %v1105_v62  ;;  %v933_v62 = vadd.f32 %v1902_v14, %v1945_v49 }
 0x20b   : > { %1183 = vmatprep.subr.mxu0 %v1104_v1 }
 0x20c   : > { %v2015_v6 = vpop.f32.mrf.mxu1 }
 0x20e   : > { %v2019_v9 = vpop.f32.mrf.mxu1  ;;  %1184 = vmatpush1.xpose.msra.mxu0 %v1103_v4  ;;  %v1090_v4 = vmax.f32 %v933_v62, 0.0 }
 0x20f   : > { %1185 = vmatprep.subr.mxu0 %v1102_v7  ;;  %v1089_v7 = vmax.f32 %v931_v26, 0.0 }
 0x210   : > { %v2023_v12 = vpop.f32.mrf.mxu1 }
 0x212   : > { %v2027_v43 = vpop.f32.mrf.mxu1  ;;  %1186 = vmatpush1.xpose.msra.mxu0 %v1101_v10 }
 0x213   : > { %1187 = vmatprep.subr.mxu0 %v1100_v41 }
 0x214   : > { %v2031_v40 = vpop.f32.mrf.mxu1 }
 0x216   : > { %v1064_v48 = vpop.f32.mrf.mxu1  ;;  %1188 = vmatpush1.xpose.msra.mxu0 %v1099_v44 }
 0x217   : > { %1189 = vmatprep.subr.mxu0 %v1098_v39  ;;  %v1065_v57 = vadd.f32 %v1064_v48, %v1942_v47  ;;  %v1055_v48 = vadd.f32 %v2019_v9, %v1942_v47  ;;  %v1045_v9 = vadd.f32 %v2003_v61, %v1942_v47  ;;  %v1035_v61 = vadd.f32 %v1987_v51, %v1942_v47 }
 0x218   : > { %v1066_v37 = vpop.f32.mrf.mxu1  ;;  %v1025_v51 = vadd.f32 %v1975_v11, %v1942_v47  ;;  %v1015_v11 = vadd.f32 %v1963_v63, %v1942_v47  ;;  %v1553_v63 = vmov 1966171168  }
 0x219   : > { %v1067_v36 = vadd.f32 %v1066_v37, %v1945_v49 }
 0x21a   : > { %v1070_v19 = vpop.f32.mrf.mxu1  ;;  %1190 = vmatpush1.xpose.msra.mxu0 %v1097_v50 }
 0x21b   : > { %1191 = vmatprep.subr.mxu0 %v1096_v53  ;;  %v1071_v38 = vadd.f32 %v1070_v19, %v1942_v47  ;;  %v1144_v25 = vmax.f32 %v1067_v36, 0.0  ;;  %v1057_v19 = vadd.f32 %v2023_v12, %v1945_v49  ;;  %v1047_v12 = vadd.f32 %v2007_v0, %v1945_v49 }
 0x21c   : > { %v1072_v35 = vpop.f32.mrf.mxu1  ;;  %v1037_v0 = vadd.f32 %v1991_v52, %v1945_v49  ;;  %v1027_v52 = vadd.f32 %v1978_v42, %v1945_v49  ;;  %v1017_v42 = vadd.f32 %v1966_v3, %v1945_v49 }
 0x21d   : > { %v1073_v24 = vadd.f32 %v1072_v35, %v1945_v49  ;;  %v1061_v35 = vadd.f32 %v2027_v43, %v1942_v47  ;;  %v1140_v62 = vmax.f32 %v1057_v19, 0.0  ;;  %v1051_v43 = vadd.f32 %v2011_v22, %v1942_v47 }
 0x21e   : > { %v1074_v59 = vpop.f32.mrf.mxu1  ;;  %1192 = vmatpush1.xpose.msra.mxu0 %v1095_v18  ;;  %v1041_v22 = vadd.f32 %v1995_v56, %v1942_v47  ;;  %v1031_v56 = vadd.f32 %v1981_v45, %v1942_v47  ;;  %v1021_v45 = vadd.f32 %v1969_v5, %v1942_v47  ;;  %v1011_v5 = vadd.f32 %v1955_v55, %v1942_v47 }
 0x21f   : > { %1193 = vmatprep.subr.mxu0 %v1094_v34  ;;  %v1075_v2 = vadd.f32 %v1074_v59, %v1942_v47  ;;  %v1146_v18 = vmax.f32 %v1073_v24, 0.0  ;;  %v1145_v34 = vmax.f32 %v1071_v38, 0.0  ;;  %v1063_v59 = vadd.f32 %v2031_v40, %v1945_v49 }
 0x220   : > { %v1076_v33 = vpop.f32.mrf.mxu1  ;;  %v1053_v40 = vadd.f32 %v2015_v6, %v1945_v49  ;;  %v1137_v26 = vmax.f32 %v1051_v43, 0.0  ;;  %v1043_v6 = vadd.f32 %v1999_v58, %v1945_v49  ;;  %v1033_v58 = vadd.f32 %v1984_v46, %v1945_v49 }
 0x221   : > { %v1077_v13 = vadd.f32 %v1076_v33, %v1945_v49  ;;  %v1147_v53 = vmax.f32 %v1075_v2, 0.0  ;;  %v1142_v37 = vmax.f32 %v1063_v59, 0.0  ;;  %v1141_v33 = vmax.f32 %v1061_v35, 0.0 }
 0x222   : > { %v1080_v1 = vpop.f32.mrf.mxu1  ;;  %1194 = vmatpush1.xpose.msra.mxu0 %v1093_v17  ;;  %v1143_v17 = vmax.f32 %v1065_v57, 0.0  ;;  %v1023_v46 = vadd.f32 %v1972_v8, %v1945_v49  ;;  %v1013_v8 = vadd.f32 %v1960_v60, %v1945_v49  ;;  %v1121_v3 = vmax.f32 %v1011_v5, 0.0 }
 0x223   : > { %1195 = vmatprep.subr.mxu0 %v1092_v32  ;;  %v1081_v41 = vadd.f32 %v1080_v1, %v1942_v47  ;;  %v1148_v50 = vmax.f32 %v1077_v13, 0.0  ;;  %v1139_v32 = vmax.f32 %v1055_v48, 0.0  ;;  %v1138_v1 = vmax.f32 %v1053_v40, 0.0 }
 0x224   : > { %v1082_v31 = vpop.f32.mrf.mxu1  ;;  %v1124_v13 = vmax.f32 %v1017_v42, 0.0  ;;  %v1122_v2 = vmax.f32 %v1013_v8, 0.0  ;;  %v1155_v24 = vstv %s1154_s22 }
 0x225   : > { %v1083_v10 = vadd.f32 %v1082_v31, %v1945_v49  ;;  %v1149_v39 = vmax.f32 %v1081_v41, 0.0  ;;  %v1135_v31 = vmax.f32 %v1045_v9, 0.0  ;;  %v1126_v41 = vmax.f32 %v1023_v46, 0.0 }
 0x226   : > { %v1084_v30 = vpop.f32.mrf.mxu1  ;;  %1196 = vmatpush1.xpose.msra.mxu0 %v1091_v16  ;;  %v1136_v16 = vmax.f32 %v1047_v12, 0.0 }
 0x227   : > { %1197 = vmatprep.subr.mxu0 %v1090_v4  ;;  %v1085_v15 = vadd.f32 %v1084_v30, %v1942_v47  ;;  %v1150_v44 = vmax.f32 %v1083_v10, 0.0  ;;  %v1134_v4 = vmax.f32 %v1043_v6, 0.0  ;;  %v1133_v30 = vmax.f32 %v1041_v22, 0.0 }
 0x228   : > { %v1086_v29 = vpop.f32.mrf.mxu1  ;;  %v1129_v10 = vmax.f32 %v1031_v56, 0.0 }
 0x229   : > { %v1087_v14 = vadd.f32 %v1086_v29, %v1945_v49  ;;  %v1151_v27 = vmax.f32 %v1085_v15, 0.0  ;;  %v1131_v15 = vmax.f32 %v1035_v61, 0.0  ;;  %v1130_v29 = vmax.f32 %v1033_v58, 0.0 }
 0x22a   : > { %1198 = vmatpush1.xpose.msra.mxu0 %v1089_v7  ;;  %v1132_v7 = vmax.f32 %v1037_v0, 0.0  ;;  %v1242_v49 = vunpack.c.l.s4 %v1553_v63 }
 0x22b   : > { %v1152_v28 = vmax.f32 %v1087_v14, 0.0  ;;  %v1128_v14 = vmax.f32 %v1027_v52, 0.0 }
 0x22c   : > { %v1243_v60 = vunpack.c.0.s8 %v1242_v49 }
 0x22d   : > { %1199 = vmatprep.subr.mxu0 %v1152_v28  ;;  %v1127_v28 = vmax.f32 %v1025_v51, 0.0 }
 0x22e   : > { %1200 = vmatpush2.xpose.msra.mxu0 %v1151_v27  ;;  %v1125_v27 = vmax.f32 %v1021_v45, 0.0 }
 0x22f   : > { %1201 = vmatprep.subr.mxu0 %v1150_v44  ;;  %v1123_v44 = vmax.f32 %v1015_v11, 0.0 }
 0x232   : > { %1202 = vmatpush2.xpose.msra.mxu0 %v1149_v39  ;;  %v1160_v39 = vrot.slane %v1953_v54, %v1825_v23 }
 0x233   : > { %1203 = vmatprep.subr.mxu0 %v1148_v50 }
 0x236   : > { %1204 = vmatpush2.xpose.msra.mxu0 %v1147_v53  ;;  %v1246_v53 = vsub.s32 %v1243_v60, %v1819_v21 }
 0x237   : > { %1205 = vmatprep.subr.mxu0 %v1146_v18 }
 0x23a   : > { %1206 = vmatpush2.xpose.msra.mxu0 %v1145_v34 }
 0x23b   : > { %1207 = vmatprep.subr.mxu0 %v1144_v25 }
 0x23e   : > { %1208 = vmatpush2.xpose.msra.mxu0 %v1143_v17 }
 0x23f   : > { %1209 = vmatprep.subr.mxu0 %v1142_v37 }
 0x242   : > { %1210 = vmatpush2.xpose.msra.mxu0 %v1141_v33 }
 0x243   : > { %1211 = vmatprep.subr.mxu0 %v1140_v62 }
 0x246   : > { %1212 = vmatpush2.xpose.msra.mxu0 %v1139_v32 }
 0x247   : > { %1213 = vmatprep.subr.mxu0 %v1138_v1 }
 0x24a   : > { %1214 = vmatpush2.xpose.msra.mxu0 %v1137_v26 }
 0x24b   : > { %1215 = vmatprep.subr.mxu0 %v1136_v16 }
 0x24e   : > { %1216 = vmatpush2.xpose.msra.mxu0 %v1135_v31 }
 0x24f   : > { %1217 = vmatprep.subr.mxu0 %v1134_v4 }
 0x252   : > { %1218 = vmatpush2.xpose.msra.mxu0 %v1133_v30 }
 0x253   : > { %1219 = vmatprep.subr.mxu0 %v1132_v7 }
 0x256   : > { %1220 = vmatpush2.xpose.msra.mxu0 %v1131_v15 }
 0x257   : > { %1221 = vmatprep.subr.mxu0 %v1130_v29 }
 0x25a   : > { %1222 = vmatpush2.xpose.msra.mxu0 %v1129_v10 }
 0x25b   : > { %1223 = vmatprep.subr.mxu0 %v1128_v14 }
 0x25e   : > { %1224 = vmatpush2.xpose.msra.mxu0 %v1127_v28 }
 0x25f   : > { %1225 = vmatprep.subr.mxu0 %v1126_v41 }
 0x262   : > { %1226 = vmatpush2.xpose.msra.mxu0 %v1125_v27 }
 0x263   : > { %1227 = vmatprep.subr.mxu0 %v1124_v13 }
 0x266   : > { %1228 = vmatpush2.xpose.msra.mxu0 %v1123_v44 }
 0x267   : > { %1229 = vmatprep.subr.mxu0 %v1122_v2 }
 0x26a   : > { %1230 = vmatpush2.xpose.msra.mxu0 %v1121_v3 }
 0x26d   : > { %1232 = vmatmul.mubr.f32.vlgmr.msra.gmra.mxu0 %v1160_v39 }
 0x32d   : > { %v1233_v50 = vpop.f32.mrf.mxu0 }
 0x32e   : > { %v1234_v55 = vadd.f32 %v1233_v50, %v1155_v24 }
 0x32f   : > { %v1235_v47 = vpop.f32.mrf.mxu0 }
 0x330   : > { %v1236_v38 = vadd.f32 %v1235_v47, %v1155_v24 }
 0x332   : > { %v1240_v36 = vcombine.low %v1234_v55, %v1236_v38 }
 0x334   : > { %v1247_v23 = vrot.slane %v1240_v36, %v1246_v53 }
 0x336   : > { %v1254_v54 = vrot.slane %v1247_v23, %v1246_v53 }
 0x338   : > { %1260 = vst.msk [vmem:[%s273_s25] sm:$0x3] %vm1258_vm1, %v1254_v54 }
 0x339   : > { %1503 = shalt.err (!%p1500_p3)
}
 0x33a   : > { %s1504_s20 = scalar_lea.hbm %s1274_s10, 32  ;;  %s1508_s22 = scalar_lea.hbm %s2148_s7, 64 }
 0x33b   : > { %p1505_p4 = scmp.ne.s32.totalorder %s1274_s10, %s1504_s20  ;;  %p1509_p9 = scmp.lt.s32.totalorder %s1274_s10, %s2148_s7 }
 0x33c   : > { %p1510_p10 = scmp.lt.s32.totalorder %s1508_s22, %s1504_s20 }
 0x33d   : > { %p1506_p7 = pnand %p1505_p4, %p1633_p5 }
 0x33e   : > { %p1511_p11 = por %p1510_p10, %p1509_p9 }
 0x33f   : > { %p1507_p8 = pneg %p1506_p7 }
 0x341   : > { %p1512_p12 = pnand %p1511_p11, %p1507_p8 }
 0x343   : > { %1515 = shalt.err (!%p1512_p12)
}
 0x344   : > { %1398 = dma.vmem_to_hbm [thread:$0]  (%p1633_p5), %s1277_s6, 32, %s1274_s10, %s1262_s14  }
 0x345 PF: > { %p1404_p13 = scmp.ge.s32.totalorder %s1550_s29, 2  ;;  %s1288_s25 = sand.u32 1, %s1538_s26  }
 0x346   : > { %s1289_s30 = scalar_lea.sflag [#allocation4], %s1288_s25 }
 0x347   : > { %p1401_p0 = pnand %p1404_p13, %p1637_p6 }
 0x349   : > { %p1402_p1 = pneg %p1401_p0 }
 0x34b   : > { %1533 = dma.done.wait (%p1402_p1), %s1289_s30, 32  }
 0x34c   : > { %1535 = vsyncadd (%p1402_p1), %s1289_s30, 4294967264  ;;  %p18_p2 = scmp.ge.s32.totalorder %s1621_s8, 4   ;;  %s2151_s26 = smov %s1542_s27 }
 0x34d   : > { %s2152_s27 = smov %s1546_s28  ;;  %s2153_s28 = smov %s1631_s11 }
 0x34e   : > { %s2154_s29 = smov %s1621_s8  ;;  %20 = sbr.rel (!%p18_p2) target bundleno = 5 (0x5), region = 83 }
 0x353   :  { %1294 = vsyncpa [#allocation4], 1 }
 0x354   :  { %1296 = vsyncpa [#allocation4 + $0x1], 1 }

</bundles_post_ra>
